<compile_context>
chip_gen: v6e
topology: v6e:2x2x1
jax: 0.10.0
libtpu: 0.0.40
codegen_flags: <defaults>
</compile_context>

<pallas_src>
import functools
import math

import jax
import jax.numpy as jnp
from jax.experimental import pallas as pl
from jax.experimental.pallas import tpu as pltpu

MAX_TM = 256       # cap on the row tile of the fused matmul kernel
BN_EPS = 1e-5
VMEM_LIMIT = 48 * 1024 * 1024   # safe on v5e/v6e (128 MiB) and v7x (64 MiB)


# ----------------------------------------------------------------------------
# Pallas kernels
# ----------------------------------------------------------------------------
def _mm_bias_kernel(a_ref, w_ref, bias_ref, o_ref, *, apply_relu):
    """out = [relu]( A @ W + bias ) for one (TM, TN) tile. BN scale pre-folded
    into W; A/W are bf16, accumulation f32."""
    acc = jnp.dot(a_ref[...], w_ref[...], preferred_element_type=jnp.float32)
    out = acc + bias_ref[...]
    if apply_relu:
        out = jnp.maximum(out, 0.0)
    o_ref[...] = out


def _mm_bias_res_kernel(a_ref, w_ref, bias_ref, res_ref, o_ref, *, apply_relu):
    """out = [relu]( A @ W + bias + residual ) for one (TM, TN) tile."""
    acc = jnp.dot(a_ref[...], w_ref[...], preferred_element_type=jnp.float32)
    out = acc + bias_ref[...] + res_ref[...]
    if apply_relu:
        out = jnp.maximum(out, 0.0)
    o_ref[...] = out


def _maxpool_kernel(w_ref, o_ref):
    """w_ref: [9, TM, C] stacked shifted windows -> elementwise max over axis 0."""
    o_ref[...] = jnp.max(w_ref[...], axis=0)


# ----------------------------------------------------------------------------
# Helpers
# ----------------------------------------------------------------------------
def _round_up(x, m):
    return ((x + m - 1) // m) * m


def _pad_rows_to(x, mp, value=0.0):
    m = x.shape[0]
    if mp != m:
        x = jnp.pad(x, ((0, mp - m),) + ((0, 0),) * (x.ndim - 1),
                    constant_values=value)
    return x


# ----------------------------------------------------------------------------
# Pallas wrappers
# ----------------------------------------------------------------------------
def fused_matmul(a, w, bias, residual, apply_relu):
    """a: [M, K] patches (any float dtype), w: [K, N] with BN scale folded in,
    bias: [N] f32, residual: [M, N] f32 or None."""
    M, K = a.shape
    N = w.shape[1]

    # bf16 inputs, f32 accumulation (native MXU rate on all generations)
    a = a.astype(jnp.bfloat16)
    w = w.astype(jnp.bfloat16)

    # K -> multiple of 128 for lane-aligned loads (zero padding is neutral)
    Kp = _round_up(K, 128)
    if Kp != K:
        a = jnp.pad(a, ((0, 0), (0, Kp - K)))
        w = jnp.pad(w, ((0, Kp - K), (0, 0)))

    # M tile: only pad to the sublane multiple of 8; cap the tile at 256 rows
    Mp8 = _round_up(M, 8)
    if Mp8 <= MAX_TM:
        tm, Mp = Mp8, Mp8
    else:
        tm = MAX_TM
        Mp = _round_up(M, MAX_TM)
    a = _pad_rows_to(a, Mp)

    # N tile: shard wide outputs over a second parallel grid axis (megacore)
    tn = 256 if N % 256 == 0 else N
    grid = (Mp // tm, N // tn)

    bias2 = bias.reshape(1, N).astype(jnp.float32)

    cparams = pltpu.CompilerParams(
        dimension_semantics=("parallel", "parallel"),
        vmem_limit_bytes=VMEM_LIMIT,
    )

    if residual is None:
        kernel = functools.partial(_mm_bias_kernel, apply_relu=apply_relu)
        out = pl.pallas_call(
            kernel,
            out_shape=jax.ShapeDtypeStruct((Mp, N), jnp.float32),
            grid=grid,
            in_specs=[
                pl.BlockSpec((tm, Kp), lambda i, j: (i, 0)),
                pl.BlockSpec((Kp, tn), lambda i, j: (0, j)),
                pl.BlockSpec((1, tn), lambda i, j: (0, j)),
            ],
            out_specs=pl.BlockSpec((tm, tn), lambda i, j: (i, j)),
            compiler_params=cparams,
        )(a, w, bias2)
    else:
        res = _pad_rows_to(residual.astype(jnp.float32), Mp)
        kernel = functools.partial(_mm_bias_res_kernel, apply_relu=apply_relu)
        out = pl.pallas_call(
            kernel,
            out_shape=jax.ShapeDtypeStruct((Mp, N), jnp.float32),
            grid=grid,
            in_specs=[
                pl.BlockSpec((tm, Kp), lambda i, j: (i, 0)),
                pl.BlockSpec((Kp, tn), lambda i, j: (0, j)),
                pl.BlockSpec((1, tn), lambda i, j: (0, j)),
                pl.BlockSpec((tm, tn), lambda i, j: (i, j)),
            ],
            out_specs=pl.BlockSpec((tm, tn), lambda i, j: (i, j)),
            compiler_params=cparams,
        )(a, w, bias2, res)

    return out[:M]


def maxpool_3x3_s2_p1(x_nhwc):
    """MaxPool2d(kernel=3, stride=2, padding=1) on NHWC via a tiled Pallas
    max-reduction over 9 shifted windows."""
    B, H, W, C = x_nhwc.shape
    xp = jnp.pad(x_nhwc, ((0, 0), (1, 1), (1, 1), (0, 0)),
                 constant_values=-jnp.inf)
    Ho = (H + 2 - 3) // 2 + 1
    Wo = (W + 2 - 3) // 2 + 1
    wins = [
        xp[:, i:i + 2 * Ho:2, j:j + 2 * Wo:2, :].reshape(B * Ho * Wo, C)
        for i in range(3) for j in range(3)
    ]
    windows = jnp.stack(wins, axis=0)                     # [9, M, C]
    M = B * Ho * Wo
    tm = min(512, _round_up(M, 8))
    Mp = _round_up(M, tm)
    if Mp != M:
        windows = jnp.pad(windows, ((0, 0), (0, Mp - M), (0, 0)),
                          constant_values=-jnp.inf)

    out = pl.pallas_call(
        _maxpool_kernel,
        out_shape=jax.ShapeDtypeStruct((Mp, C), jnp.float32),
        grid=(Mp // tm,),
        in_specs=[pl.BlockSpec((9, tm, C), lambda i: (0, i, 0))],
        out_specs=pl.BlockSpec((tm, C), lambda i: (i, 0)),
        compiler_params=pltpu.CompilerParams(
            dimension_semantics=("parallel",),
            vmem_limit_bytes=VMEM_LIMIT,
        ),
    )(windows)
    return out[:M].reshape(B, Ho, Wo, C)


# ----------------------------------------------------------------------------
# Glue: im2col, conv+bn(+relu)(+residual), BasicBlock, full model
# ----------------------------------------------------------------------------
def extract_patches(x_nhwc, kh, kw, stride, pad):
    B, H, W, C = x_nhwc.shape
    xp = jnp.pad(x_nhwc, ((0, 0), (pad, pad), (pad, pad), (0, 0)))
    Ho = (H + 2 * pad - kh) // stride + 1
    Wo = (W + 2 * pad - kw) // stride + 1
    cols = []
    for i in range(kh):
        for j in range(kw):
            cols.append(xp[:, i:i + stride * Ho:stride,
                           j:j + stride * Wo:stride, :])
    patches = jnp.concatenate(cols, axis=-1)              # [B, Ho, Wo, kh*kw*C]
    return patches.reshape(B * Ho * Wo, kh * kw * C), (B, Ho, Wo)


def conv_bn(x_nhwc, p, stride, pad, relu, residual=None):
    """p: {'w': [kh,kw,Cin,Cout] (HWIO), 'scale': [Cout], 'bias': [Cout]}."""
    kh, kw, cin, cout = p['w'].shape
    patches, (B, Ho, Wo) = extract_patches(x_nhwc, kh, kw, stride, pad)
    # Fold the BN scale into the weight matrix (wrapper-side precompute).
    wmat = p['w'].reshape(kh * kw * cin, cout) * p['scale'][None, :]
    res = None if residual is None else residual.reshape(-1, cout)
    out = fused_matmul(patches, wmat, p['bias'], res, relu)
    return out.reshape(B, Ho, Wo, cout)


def basic_block(x, params, stride):
    out = conv_bn(x, params['conv1'], stride, 1, relu=True)
    if 'down' in params:
        identity = conv_bn(x, params['down'], stride, 0, relu=False)
    else:
        identity = x
    # out = relu(bn2(conv2(out)) + identity)  -- residual & relu fused in kernel
    out = conv_bn(out, params['conv2'], 1, 1, relu=True, residual=identity)
    return out


def resnet_cam_forward(x_nchw, params):
    x = jnp.transpose(x_nchw, (0, 2, 3, 1))                     # NCHW -> NHWC
    x = conv_bn(x, params['stem'], stride=2, pad=3, relu=True)  # conv1+bn1+relu
    x = maxpool_3x3_s2_p1(x)                                    # maxpool
    for name, stride in (('layer1', 1), ('layer2', 2),
                         ('layer3', 2), ('layer4', 1)):
        for blk in params[name]:
            x = basic_block(x, blk, stride)
            stride = 1  # only the first block of a layer strides
    return jnp.transpose(x, (0, 3, 1, 2))                       # NHWC -> NCHW


# ----------------------------------------------------------------------------
# Deterministic parameter init (xavier_uniform convs, identity-eval BN)
# ----------------------------------------------------------------------------
def _xavier_conv(key, kh, kw, cin, cout):
    fan_in = cin * kh * kw
    fan_out = cout * kh * kw
    bound = math.sqrt(6.0 / (fan_in + fan_out))
    return jax.random.uniform(key, (kh, kw, cin, cout),
                              minval=-bound, maxval=bound, dtype=jnp.float32)


def _bn_affine(c):
    # eval-mode BN with gamma=1, beta=0, running_mean=0, running_var=1
    scale = jnp.full((c,), 1.0 / math.sqrt(1.0 + BN_EPS), jnp.float32)
    bias = jnp.zeros((c,), jnp.float32)
    return scale, bias


def make_params(key):
    keys = iter(jax.random.split(key, 32))

    def conv_bn_params(kh, kw, cin, cout):
        w = _xavier_conv(next(keys), kh, kw, cin, cout)
        s, b = _bn_affine(cout)
        return {'w': w, 'scale': s, 'bias': b}

    params = {'stem': conv_bn_params(7, 7, 3, 64)}
    inplanes = 64
    cfg = [('layer1', 64, 1, 1), ('layer2', 128, 1, 2),
           ('layer3', 256, 1, 2), ('layer4', 512, 1, 1)]
    for name, planes, nblocks, stride in cfg:
        blocks = []
        for bi in range(nblocks):
            s = stride if bi == 0 else 1
            blk = {
                'conv1': conv_bn_params(3, 3, inplanes, planes),
                'conv2': conv_bn_params(3, 3, planes, planes),
            }
            if s != 1 or inplanes != planes:   # get_downsampling_layer
                blk['down'] = conv_bn_params(1, 1, inplanes, planes)
            blocks.append(blk)
            inplanes = planes
        params[name] = blocks
    return params


# ----------------------------------------------------------------------------
if __name__ == "__main__":
    key = jax.random.PRNGKey(0)
    pkey, xkey = jax.random.split(key)
    params = make_params(pkey)

    # small input consistent with the module: 3-channel image
    x = jax.random.normal(xkey, (2, 3, 32, 32), dtype=jnp.float32)

    out = resnet_cam_forward(x, params)
    out = jax.block_until_ready(out)
    assert out.shape == (2, 512, 2, 2), out.shape
    assert bool(jnp.all(jnp.isfinite(out)))
    print("KERNEL_OK")
</pallas_src>

<mosaic_0001>
module attributes {stable_mosaic.version = 11 : i64} {
  func.func @_mm_bias_kernel(%arg0: i32, %arg1: i32, %arg2: memref<256x256xbf16, #tpu.memory_space<vmem>>, %arg3: memref<256x64xbf16, #tpu.memory_space<vmem>>, %arg4: memref<1x64xf32, #tpu.memory_space<vmem>>, %arg5: memref<256x64xf32, #tpu.memory_space<vmem>>) attributes {dimension_semantics = [#tpu.dimension_semantics<parallel>, #tpu.dimension_semantics<parallel>], iteration_bounds = array<i64: 2, 1>, scalar_prefetch = 0 : i64, scratch_operands = 0 : i64, tpu.core_type = #tpu.core_type<tc>, window_params = [{transform_indices = @transform_0, window_bounds = array<i64: 256, 256>}, {transform_indices = @transform_1, window_bounds = array<i64: 256, 64>}, {transform_indices = @transform_2, window_bounds = array<i64: 1, 64>}, {transform_indices = @transform_3, window_bounds = array<i64: 256, 64>}]} {
    %c0 = arith.constant 0 : index
    %c0_0 = arith.constant 0 : index
    %0 = vector.load %arg2[%c0, %c0_0] : memref<256x256xbf16, #tpu.memory_space<vmem>>, vector<256x256xbf16>
    %c0_1 = arith.constant 0 : index
    %c0_2 = arith.constant 0 : index
    %1 = vector.load %arg3[%c0_1, %c0_2] : memref<256x64xbf16, #tpu.memory_space<vmem>>, vector<256x64xbf16>
    %cst = arith.constant dense<0.000000e+00> : vector<256x64xf32>
    %2 = tpu.matmul %0, %1, %cst {dimension_numbers = #tpu.dot_dimension_numbers<[1], [0], [0], [1], [0, 0, 1, 1], [], []>} : vector<256x256xbf16>, vector<256x64xbf16>, vector<256x64xf32> -> vector<256x64xf32>
    %c0_3 = arith.constant 0 : index
    %c0_4 = arith.constant 0 : index
    %3 = vector.load %arg4[%c0_3, %c0_4] : memref<1x64xf32, #tpu.memory_space<vmem>>, vector<1x64xf32>
    %4 = vector.broadcast %3 : vector<1x64xf32> to vector<256x64xf32>
    %5 = arith.addf %2, %4 : vector<256x64xf32>
    %cst_5 = arith.constant 0.000000e+00 : f32
    %6 = vector.broadcast %cst_5 : f32 to vector<256x64xf32>
    %7 = arith.maximumf %5, %6 : vector<256x64xf32>
    %c0_6 = arith.constant 0 : index
    %c0_7 = arith.constant 0 : index
    %8 = vector.load %arg5[%c0_6, %c0_7] : memref<256x64xf32, #tpu.memory_space<vmem>>, vector<256x64xf32>
    tpu.vector_store %arg5[%c0_6, %c0_7], %7 {strides = array<i32>} : memref<256x64xf32, #tpu.memory_space<vmem>>, vector<256x64xf32>,
    return
  }
  func.func @transform_0(%arg0: i32, %arg1: i32) -> (i32, i32) {
    %c0_i32 = arith.constant 0 : i32
    %c0_i32_0 = arith.constant 0 : i32
    return %arg0, %c0_i32 : i32, i32
  }
  func.func @transform_1(%arg0: i32, %arg1: i32) -> (i32, i32) {
    %c0_i32 = arith.constant 0 : i32
    %c0_i32_0 = arith.constant 0 : i32
    return %c0_i32, %arg1 : i32, i32
  }
  func.func @transform_2(%arg0: i32, %arg1: i32) -> (i32, i32) {
    %c0_i32 = arith.constant 0 : i32
    %c0_i32_0 = arith.constant 0 : i32
    return %c0_i32, %arg1 : i32, i32
  }
  func.func @transform_3(%arg0: i32, %arg1: i32) -> (i32, i32) {
    %c0_i32 = arith.constant 0 : i32
    return %arg0, %arg1 : i32, i32
  }
}

</mosaic_0001>

<bundles_post_ra>
// kernel: tpu_custom_call.1
= control target key start
LH: loop header
LB: loop body
LE: loop exit
PB: predicated region body
PF: predicated region fallthrough
CT: control target
= control target key end

     0   :  { %8 = vsyncpa [#allocation3], 0  ;;  %s1611_s0 = inlined_call_operand.hbm [shape: bf16[512,256], index: 0, kind: input, shape index: {}]   ;;  %s1612_s1 = inlined_call_operand.vmem [shape: bf16[256,64], index: 1, kind: input, shape index: {}]   ;;  %s1613_s2 = inlined_call_operand.vmem [shape: f32[1,64], index: 2, kind: input, shape index: {}]   ;;  %s1614_s3 = inlined_call_operand.vmem [shape: f32[512,64], index: 3, kind: output, shape index: {}]  }
   0x1   :  { %10 = vsyncpa [#allocation3 + $0x1], 0  ;;  %s1331_s12 = smov 0   ;;  %s1333_s13 = smov 0  }
   0x2   :  { %s1335_s14 = smov 0   ;;  %s1337_s15 = smov 0  }
   0x3   :  { %s1339_s16 = smov 0   ;;  %s1341_s17 = smov 0  }
   0x4 LB: > { %s912_s18 = sadd.s32 4294967295, %s1306_s17   ;;  %s28_s19 = sadd.s32 1, %s1302_s16  ;;  %s1306_s17 = sphi %s1341_s17, %s16_s17   ;;  %s1302_s16 = sphi %s1339_s16, %s1622_s16   ;;  %s1298_s15 = sphi %s1337_s15, %s1621_s15   ;;  %s1294_s14 = sphi %s1335_s14, %s1620_s14   ;;  %s1290_s13 = sphi %s1333_s13, %s1619_s13   ;;  %s1286_s12 = sphi %s1331_s12, %s1618_s12  }
   0x5   : > { %p30_p0 = scmp.ge.s32.totalorder %s28_s19, 2  ;;  %s35_s20 = sadd.s32 1, %s1294_s14 }
   0x6   : > { %p42_p1 = scmp.ne.s32.totalorder %s1294_s14, %s1290_s13  ;;  %p43_p2 = scmp.eq.s32.totalorder %s1306_s17, 0 }
   0x7   : > { %s1624_s19 = smov (%p30_p0, %s28_s19), 0  ;;  %p48_p4 = scmp.ne.s32.totalorder %s1290_s13, %s1286_s12 }
   0x8   : > { %p1367_p3 = por %p43_p2, %p42_p1  ;;  %s32_s22 = ssub.s32 %s1302_s16, %s1624_s19 }
   0x9   : > { %p49_p5 = scmp.eq.s32.totalorder %s912_s18, 0  ;;  %p33_p6 = scmp.eq.s32.totalorder %s32_s22, 0 }
   0xa   : > { %p1113_p8 = scmp.lt.s32.totalorder %s1306_s17, 2  ;;  %s165_s25 = sand.u32 1, %s1294_s14  }
   0xb   : > { %p1374_p7 = por %p49_p5, %p48_p4  ;;  %s978_s26 = sshll.u32 %s1302_s16, 12 }
   0xc   : > { %s1380_s24 = scalar_select %p33_p6, %s1294_s14, %s35_s20  }
   0xd   : > { %s918_s27 = sshll.u32 %s165_s25, 8  ;;  %s176_s30 = scalar_lea.hbm %s1611_s0, %s978_s26 }
   0xe   : > { %s169_s4 = scalar_lea.vmem [#allocation2], %s918_s27  ;;  %p1389_p9 = pnand %p1113_p8, %p1367_p3 }
   0xf   : > { %s177_s5 = sshll.u32 %s169_s4, 4  ;;  %s166_s7 = scalar_lea.sflag [#allocation3], %s165_s25  ;;  %s178_s5 = int_to_ptr.vmem [resolvable:$true] %s177_s5 }
  0x10   : > { %p1230_p10 = pneg %p1389_p9  ;;  %s1241_s8 = scalar_lea.vmem %s178_s5, 4096 }
  0x11   : > { %p1242_p11 = scmp.ne.s32.totalorder %s178_s5, %s1241_s8  ;;  %s1308_s9 = smov [#allocation2]  }
  0x12   : > { %s1246_s10 = sshll.u32 %s1308_s9, 4  ;;  %s1247_s10 = int_to_ptr.vmem [resolvable:$false] %s1246_s10 }
  0x13   : > { %p1244_p12 = pnand %p1242_p11, %p1230_p10  ;;  %s1248_s11 = scalar_lea.vmem %s1247_s10, 8192 }
  0x14   : > { %p1249_p0 = scmp.lt.s32.totalorder %s178_s5, %s1247_s10  ;;  %p1250_p1 = scmp.lt.s32.totalorder %s1248_s11, %s1241_s8 }
  0x15   : > { %p1245_p13 = pneg %p1244_p12 }
  0x16   : > { %p1251_p2 = por %p1250_p1, %p1249_p0 }
  0x18   : > { %p1252_p3 = pnand %p1251_p2, %p1245_p13 }
  0x1a   : > { %1255 = shalt.err (!%p1252_p3)
}
  0x1b   : > { %s1309_s12 = smov 128   ;;  %s1310_s18 = smov 8  }
  0x1c   : > { %1112 = dma.hbm_to_vmem [thread:$0]  (!%p1389_p9), %s176_s30, 4096, %s178_s5, %s166_s7, %s1309_s12, %s1309_s12, %s1310_s18  }
  0x1d   : > { %p922_p4 = scmp.ge.s32.totalorder %s1306_s17, 1  ;;  %p185_p5 = scmp.lt.s32.totalorder %s1306_s17, 3 }
  0x1f   : > { %p186_p6 = pnand %p922_p4, %p185_p5 }
  0x20   : > { %s191_s20 = sand.u32 (!%p186_p6), 1, %s1290_s13  }
  0x21   : > { %189 = sbr.rel (%p186_p6) target bundleno = 334 (0x14e), region = 32  ;;  %s923_s21 = sshll.u32 (!%p186_p6), %s191_s20, 8 }
  0x22   : > { %s192_s22 = scalar_lea.sflag (!%p186_p6), [#allocation3], %s191_s20  ;;  %s1400_s25 = scalar_lea.vmem (!%p186_p6), [#allocation2], %s923_s21 }
  0x26   : > { %1281 = dma.done.wait (%p1374_p7), %s192_s22, 4096  }
  0x27   : > { %1283 = vsyncadd (%p1374_p7), %s192_s22, 4294963200  ;;  %v1164_v0 = vld [vmem:[%s1612_s1 + $0x78] sm:$0xff]   ;;  %v1166_v2 = vld [vmem:[%s1612_s1 + $0x70] sm:$0xff]   ;;  %s924_s11 = sshll.u32 %s1298_s15, 5  ;;  %vm766_vm0 = vcmask 523264  }
  0x28   : > { %v1165_v1 = vld [vmem:[%s1612_s1 + $0x38] sm:$0xff]   ;;  %979 = vmatprep.subr.bf16.mxu0 %v1164_v0  ;;  %1091 = vmatprep.subr.bf16.mxu1 %v1164_v0  ;;  %v1167_v3 = vld [vmem:[%s1612_s1 + $0x30] sm:$0xff]   ;;  %v1168_v4 = vld [vmem:[%s1612_s1 + $0x68] sm:$0xff]   ;;  %p237_p7 = scmp.lt.s32.totalorder %s924_s11, 63 }
  0x29   : > { %980 = vmatpush3.bf16.msra.mxu0 %v1165_v1  ;;  %1099 = vmatpush3.bf16.msra.mxu1 %v1165_v1  ;;  %v1169_v5 = vld [vmem:[%s1612_s1 + $0x28] sm:$0xff]   ;;  %v1170_v6 = vld [vmem:[%s1612_s1 + $0x60] sm:$0xff]   ;;  %v1172_v8 = vld [vmem:[%s1612_s1 + $0x58] sm:$0xff]  }
  0x2a   : > { %981 = vmatprep.subr.bf16.mxu0 %v1166_v2  ;;  %1092 = vmatprep.subr.bf16.mxu1 %v1166_v2  ;;  %v1171_v7 = vld [vmem:[%s1612_s1 + $0x20] sm:$0xff]   ;;  %v1173_v9 = vld [vmem:[%s1612_s1 + $0x18] sm:$0xff]   ;;  %v1174_v10 = vld [vmem:[%s1612_s1 + $0x50] sm:$0xff]   ;;  %s1626_s11 = smov (!%p237_p7, %s924_s11), 63 }
  0x2b   : > { %v1182_v11 = vld [vmem:[%s1400_s25 + $0x4] ss:$8 sps:$4 sm:$0xff]   ;;  %v1175_v13 = vld [vmem:[%s1612_s1 + $0x10] sm:$0xff]   ;;  %v1180_v18 = vld [vmem:[%s1400_s25] ss:$8 sps:$4 sm:$0xff]   ;;  %s925_s20 = sshll.u32 %s1626_s11, 3 }
  0x2c   : > { %v1185_v12 = vld [vmem:[%s1400_s25 + $0x84] ss:$8 sps:$4 sm:$0xff]   ;;  %605 = vmatprep.mubr.bf16.mxu0 %v1182_v11  ;;  %v1183_v19 = vld [vmem:[%s1400_s25 + $0x80] ss:$8 sps:$4 sm:$0xff]   ;;  %v1186_v20 = vld [vmem:[%s1400_s25 + $0x14] ss:$8 sps:$4 sm:$0xff]   ;;  %s1497_s21 = scalar_lea.vmem %s1614_s3, %s925_s20 }
  0x2d   : > { %982 = vmatpush3.bf16.msra.mxu0 %v1167_v3  ;;  %1100 = vmatpush3.bf16.msra.mxu1 %v1167_v3  ;;  %v1176_v14 = vld [vmem:[%s1612_s1 + $0x48] sm:$0xff]   ;;  %v1178_v16 = vld [vmem:[%s1612_s1 + $0x40] sm:$0xff]   ;;  %v1188_v21 = vld [vmem:[%s1400_s25 + $0x94] ss:$8 sps:$4 sm:$0xff]  }
  0x2e   : > { %983 = vmatprep.subr.bf16.mxu0 %v1168_v4  ;;  %1093 = vmatprep.subr.bf16.mxu1 %v1168_v4  ;;  %v1177_v15 = vld [vmem:[%s1612_s1 + $0x8] sm:$0xff]   ;;  %v1179_v17 = vld [vmem:[%s1612_s1] sm:$0xff]   ;;  %v1190_v22 = vld [vmem:[%s1400_s25 + $0x10] ss:$8 sps:$4 sm:$0xff]  }
  0x2f   : > { %669 = vmatprep.mubr.bf16.mxu1 %v1185_v12  ;;  %v1191_v23 = vld [vmem:[%s1400_s25 + $0x90] ss:$8 sps:$4 sm:$0xff]   ;;  %v1192_v24 = vld [vmem:[%s1400_s25 + $0x24] ss:$8 sps:$4 sm:$0xff]   ;;  %v1196_v26 = vld [vmem:[%s1400_s25 + $0x20] ss:$8 sps:$4 sm:$0xff]  }
  0x30   : > { %v1194_v25 = vld [vmem:[%s1400_s25 + $0xa4] ss:$8 sps:$4 sm:$0xff]   ;;  %v1197_v27 = vld [vmem:[%s1400_s25 + $0xa0] ss:$8 sps:$4 sm:$0xff]   ;;  %v1198_v28 = vld [vmem:[%s1400_s25 + $0x34] ss:$8 sps:$4 sm:$0xff]  }
  0x31   : > { %984 = vmatpush3.bf16.msra.mxu0 %v1169_v5  ;;  %1101 = vmatpush3.bf16.msra.mxu1 %v1169_v5  ;;  %v1200_v29 = vld [vmem:[%s1400_s25 + $0xb4] ss:$8 sps:$4 sm:$0xff]   ;;  %v1202_v30 = vld [vmem:[%s1400_s25 + $0x30] ss:$8 sps:$4 sm:$0xff]   ;;  %v1204_v32 = vld [vmem:[%s1400_s25 + $0x44] ss:$8 sps:$4 sm:$0xff]  }
  0x32   : > { %985 = vmatprep.subr.bf16.mxu0 %v1170_v6  ;;  %1094 = vmatprep.subr.bf16.mxu1 %v1170_v6  ;;  %v1203_v31 = vld [vmem:[%s1400_s25 + $0xb0] ss:$8 sps:$4 sm:$0xff]   ;;  %v1206_v33 = vld [vmem:[%s1400_s25 + $0xc4] ss:$8 sps:$4 sm:$0xff]   ;;  %v1208_v34 = vld [vmem:[%s1400_s25 + $0x40] ss:$8 sps:$4 sm:$0xff]  }
  0x33   : > { %v1209_v35 = vld [vmem:[%s1400_s25 + $0xc0] ss:$8 sps:$4 sm:$0xff]   ;;  %v1210_v36 = vld [vmem:[%s1400_s25 + $0x54] ss:$8 sps:$4 sm:$0xff]   ;;  %v1214_v38 = vld [vmem:[%s1400_s25 + $0x50] ss:$8 sps:$4 sm:$0xff]  }
  0x34   : > { %v1212_v37 = vld [vmem:[%s1400_s25 + $0xd4] ss:$8 sps:$4 sm:$0xff]   ;;  %v1215_v39 = vld [vmem:[%s1400_s25 + $0xd0] ss:$8 sps:$4 sm:$0xff]   ;;  %v1216_v40 = vld [vmem:[%s1400_s25 + $0x64] ss:$8 sps:$4 sm:$0xff]  }
  0x35   : > { %986 = vmatpush3.bf16.msra.mxu0 %v1171_v7  ;;  %1102 = vmatpush3.bf16.msra.mxu1 %v1171_v7  ;;  %v1218_v41 = vld [vmem:[%s1400_s25 + $0xe4] ss:$8 sps:$4 sm:$0xff]   ;;  %v1220_v42 = vld [vmem:[%s1400_s25 + $0x60] ss:$8 sps:$4 sm:$0xff]   ;;  %v1222_v44 = vld [vmem:[%s1400_s25 + $0x74] ss:$8 sps:$4 sm:$0xff]  }
  0x36   : > { %987 = vmatprep.subr.bf16.mxu0 %v1172_v8  ;;  %1095 = vmatprep.subr.bf16.mxu1 %v1172_v8  ;;  %v1221_v43 = vld [vmem:[%s1400_s25 + $0xe0] ss:$8 sps:$4 sm:$0xff]   ;;  %v1224_v45 = vld [vmem:[%s1400_s25 + $0xf4] ss:$8 sps:$4 sm:$0xff]   ;;  %v1226_v46 = vld [vmem:[%s1400_s25 + $0x70] ss:$8 sps:$4 sm:$0xff]  }
  0x37   : > { %v1227_v47 = vld [vmem:[%s1400_s25 + $0xf0] ss:$8 sps:$4 sm:$0xff]   ;;  %v1490_v50 = vld [vmem:[%s1613_s2] ss:$0 sm:$0xff] }
  0x39   : > { %988 = vmatpush3.bf16.msra.mxu0 %v1173_v9  ;;  %1103 = vmatpush3.bf16.msra.mxu1 %v1173_v9 }
  0x3a   : > { %989 = vmatprep.subr.bf16.mxu0 %v1174_v10  ;;  %1096 = vmatprep.subr.bf16.mxu1 %v1174_v10 }
  0x3d   : > { %990 = vmatpush3.bf16.msra.mxu0 %v1175_v13  ;;  %1104 = vmatpush3.bf16.msra.mxu1 %v1175_v13 }
  0x3e   : > { %991 = vmatprep.subr.bf16.mxu0 %v1176_v14  ;;  %1097 = vmatprep.subr.bf16.mxu1 %v1176_v14 }
  0x41   : > { %992 = vmatpush3.bf16.msra.mxu0 %v1177_v15  ;;  %1105 = vmatpush3.bf16.msra.mxu1 %v1177_v15 }
  0x42   : > { %993 = vmatprep.subr.bf16.mxu0 %v1178_v16  ;;  %1098 = vmatprep.subr.bf16.mxu1 %v1178_v16 }
  0x45   : > { %994 = vmatpush3.bf16.msra.mxu0 %v1179_v17  ;;  %1106 = vmatpush3.bf16.msra.mxu1 %v1179_v17 }
  0x48   : > { %606 = vmatmul.mubr.bf16.vlgmr.msra.gmra.mxu0 %v1180_v18  ;;  %670 = vmatmul.mubr.bf16.vlgmr.msra.gmra.mxu1 %v1183_v19 }
  0x49   : > { %613 = vmatprep.mubr.bf16.mxu0 %v1186_v20  ;;  %677 = vmatprep.mubr.bf16.mxu1 %v1188_v21 }
  0x50   : > { %614 = vmatmul.mubr.bf16.gmra.mxu0 %v1190_v22  ;;  %678 = vmatmul.mubr.bf16.gmra.mxu1 %v1191_v23 }
  0x51   : > { %621 = vmatprep.mubr.bf16.mxu0 %v1192_v24  ;;  %685 = vmatprep.mubr.bf16.mxu1 %v1194_v25 }
  0x58   : > { %622 = vmatmul.mubr.bf16.gmra.mxu0 %v1196_v26  ;;  %686 = vmatmul.mubr.bf16.gmra.mxu1 %v1197_v27 }
  0x59   : > { %629 = vmatprep.mubr.bf16.mxu0 %v1198_v28  ;;  %693 = vmatprep.mubr.bf16.mxu1 %v1200_v29 }
  0x60   : > { %630 = vmatmul.mubr.bf16.gmra.mxu0 %v1202_v30  ;;  %694 = vmatmul.mubr.bf16.gmra.mxu1 %v1203_v31 }
  0x61   : > { %637 = vmatprep.mubr.bf16.mxu0 %v1204_v32  ;;  %701 = vmatprep.mubr.bf16.mxu1 %v1206_v33 }
  0x68   : > { %638 = vmatmul.mubr.bf16.gmra.mxu0 %v1208_v34  ;;  %702 = vmatmul.mubr.bf16.gmra.mxu1 %v1209_v35 }
  0x69   : > { %645 = vmatprep.mubr.bf16.mxu0 %v1210_v36  ;;  %709 = vmatprep.mubr.bf16.mxu1 %v1212_v37 }
  0x70   : > { %646 = vmatmul.mubr.bf16.gmra.mxu0 %v1214_v38  ;;  %710 = vmatmul.mubr.bf16.gmra.mxu1 %v1215_v39 }
  0x71   : > { %653 = vmatprep.mubr.bf16.mxu0 %v1216_v40  ;;  %717 = vmatprep.mubr.bf16.mxu1 %v1218_v41 }
  0x78   : > { %654 = vmatmul.mubr.bf16.gmra.mxu0 %v1220_v42  ;;  %718 = vmatmul.mubr.bf16.gmra.mxu1 %v1221_v43 }
  0x79   : > { %661 = vmatprep.mubr.bf16.mxu0 %v1222_v44  ;;  %725 = vmatprep.mubr.bf16.mxu1 %v1224_v45 }
  0x80   : > { %662 = vmatmul.mubr.bf16.gmra.mxu0 %v1226_v46  ;;  %726 = vmatmul.mubr.bf16.gmra.mxu1 %v1227_v47 }
 0x108   : > { %v995_v48 = vpop.f32.mrf.mxu0  ;;  %v1043_v49 = vpop.f32.mrf.mxu1 }
 0x10a   : > { %v996_v51 = vpop.f32.mrf.mxu0  ;;  %v1044_v52 = vpop.f32.mrf.mxu1 }
 0x10b   : > { %v997_v53 = vadd.f32 %v996_v51, %v995_v48  ;;  %v1045_v54 = vadd.f32 %v1044_v52, %v1043_v49 }
 0x10c   : > { %v998_v55 = vpop.f32.mrf.mxu0  ;;  %v1046_v56 = vpop.f32.mrf.mxu1 }
 0x10d   : > { %v608_v57 = vadd.f32 %v997_v53, %v1490_v50  ;;  %v672_v58 = vadd.f32 %v1045_v54, %v1490_v50 }
 0x10e   : > { %v999_v59 = vpop.f32.mrf.mxu0  ;;  %v1047_v60 = vpop.f32.mrf.mxu1 }
 0x10f   : > { %v734_v61 = vmax.f32 %v608_v57, 0.0  ;;  %v750_v62 = vmax.f32 %v672_v58, 0.0  ;;  %v1000_v63 = vadd.f32 %v999_v59, %v998_v55  ;;  %v1048_v0 = vadd.f32 %v1047_v60, %v1046_v56 }
 0x110   : > { %v1001_v1 = vpop.f32.mrf.mxu0  ;;  %v1049_v2 = vpop.f32.mrf.mxu1 }
 0x111   : > { %767 = vst.msk [vmem:[%s1497_s21] sm:$0xff] %vm766_vm0, %v734_v61  ;;  %783 = vst.msk [vmem:[%s1497_s21 + $0x80] sm:$0xff] %vm766_vm0, %v750_v62  ;;  %v611_v3 = vadd.f32 %v1000_v63, %v1490_v50  ;;  %v675_v4 = vadd.f32 %v1048_v0, %v1490_v50 }
 0x112   : > { %v1002_v5 = vpop.f32.mrf.mxu0  ;;  %v1050_v6 = vpop.f32.mrf.mxu1 }
 0x113   : > { %v735_v7 = vmax.f32 %v611_v3, 0.0  ;;  %v751_v8 = vmax.f32 %v675_v4, 0.0  ;;  %v1003_v9 = vadd.f32 %v1002_v5, %v1001_v1  ;;  %v1051_v10 = vadd.f32 %v1050_v6, %v1049_v2 }
 0x114   : > { %v1004_v11 = vpop.f32.mrf.mxu0  ;;  %v1052_v12 = vpop.f32.mrf.mxu1 }
 0x115   : > { %768 = vst.msk [vmem:[%s1497_s21 + $0x8] sm:$0xff] %vm766_vm0, %v735_v7  ;;  %784 = vst.msk [vmem:[%s1497_s21 + $0x88] sm:$0xff] %vm766_vm0, %v751_v8  ;;  %v616_v13 = vadd.f32 %v1003_v9, %v1490_v50  ;;  %v680_v14 = vadd.f32 %v1051_v10, %v1490_v50 }
 0x116   : > { %v1005_v15 = vpop.f32.mrf.mxu0  ;;  %v1053_v16 = vpop.f32.mrf.mxu1 }
 0x117   : > { %v736_v17 = vmax.f32 %v616_v13, 0.0  ;;  %v752_v18 = vmax.f32 %v680_v14, 0.0  ;;  %v1006_v19 = vadd.f32 %v1005_v15, %v1004_v11  ;;  %v1054_v20 = vadd.f32 %v1053_v16, %v1052_v12 }
 0x118   : > { %v1007_v21 = vpop.f32.mrf.mxu0  ;;  %v1055_v22 = vpop.f32.mrf.mxu1 }
 0x119   : > { %769 = vst.msk [vmem:[%s1497_s21 + $0x10] sm:$0xff] %vm766_vm0, %v736_v17  ;;  %785 = vst.msk [vmem:[%s1497_s21 + $0x90] sm:$0xff] %vm766_vm0, %v752_v18  ;;  %v619_v23 = vadd.f32 %v1006_v19, %v1490_v50  ;;  %v683_v24 = vadd.f32 %v1054_v20, %v1490_v50 }
 0x11a   : > { %v1008_v25 = vpop.f32.mrf.mxu0  ;;  %v1056_v26 = vpop.f32.mrf.mxu1 }
 0x11b   : > { %v737_v27 = vmax.f32 %v619_v23, 0.0  ;;  %v753_v28 = vmax.f32 %v683_v24, 0.0  ;;  %v1009_v29 = vadd.f32 %v1008_v25, %v1007_v21  ;;  %v1057_v30 = vadd.f32 %v1056_v26, %v1055_v22 }
 0x11c   : > { %v1010_v31 = vpop.f32.mrf.mxu0  ;;  %v1058_v32 = vpop.f32.mrf.mxu1 }
 0x11d   : > { %770 = vst.msk [vmem:[%s1497_s21 + $0x18] sm:$0xff] %vm766_vm0, %v737_v27  ;;  %786 = vst.msk [vmem:[%s1497_s21 + $0x98] sm:$0xff] %vm766_vm0, %v753_v28  ;;  %v624_v33 = vadd.f32 %v1009_v29, %v1490_v50  ;;  %v688_v34 = vadd.f32 %v1057_v30, %v1490_v50 }
 0x11e   : > { %v1011_v35 = vpop.f32.mrf.mxu0  ;;  %v1059_v36 = vpop.f32.mrf.mxu1 }
 0x11f   : > { %v738_v37 = vmax.f32 %v624_v33, 0.0  ;;  %v754_v38 = vmax.f32 %v688_v34, 0.0  ;;  %v1012_v39 = vadd.f32 %v1011_v35, %v1010_v31  ;;  %v1060_v40 = vadd.f32 %v1059_v36, %v1058_v32 }
 0x120   : > { %v1013_v41 = vpop.f32.mrf.mxu0  ;;  %v1061_v42 = vpop.f32.mrf.mxu1 }
 0x121   : > { %771 = vst.msk [vmem:[%s1497_s21 + $0x20] sm:$0xff] %vm766_vm0, %v738_v37  ;;  %787 = vst.msk [vmem:[%s1497_s21 + $0xa0] sm:$0xff] %vm766_vm0, %v754_v38  ;;  %v627_v43 = vadd.f32 %v1012_v39, %v1490_v50  ;;  %v691_v44 = vadd.f32 %v1060_v40, %v1490_v50 }
 0x122   : > { %v1014_v45 = vpop.f32.mrf.mxu0  ;;  %v1062_v46 = vpop.f32.mrf.mxu1 }
 0x123   : > { %v739_v47 = vmax.f32 %v627_v43, 0.0  ;;  %v755_v48 = vmax.f32 %v691_v44, 0.0  ;;  %v1015_v49 = vadd.f32 %v1014_v45, %v1013_v41  ;;  %v1063_v51 = vadd.f32 %v1062_v46, %v1061_v42 }
 0x124   : > { %v1016_v52 = vpop.f32.mrf.mxu0  ;;  %v1064_v53 = vpop.f32.mrf.mxu1 }
 0x125   : > { %772 = vst.msk [vmem:[%s1497_s21 + $0x28] sm:$0xff] %vm766_vm0, %v739_v47  ;;  %788 = vst.msk [vmem:[%s1497_s21 + $0xa8] sm:$0xff] %vm766_vm0, %v755_v48  ;;  %v632_v54 = vadd.f32 %v1015_v49, %v1490_v50  ;;  %v696_v55 = vadd.f32 %v1063_v51, %v1490_v50 }
 0x126   : > { %v1017_v56 = vpop.f32.mrf.mxu0  ;;  %v1065_v57 = vpop.f32.mrf.mxu1 }
 0x127   : > { %v740_v58 = vmax.f32 %v632_v54, 0.0  ;;  %v756_v59 = vmax.f32 %v696_v55, 0.0  ;;  %v1018_v60 = vadd.f32 %v1017_v56, %v1016_v52  ;;  %v1066_v61 = vadd.f32 %v1065_v57, %v1064_v53 }
 0x128   : > { %v1019_v62 = vpop.f32.mrf.mxu0  ;;  %v1067_v63 = vpop.f32.mrf.mxu1 }
 0x129   : > { %773 = vst.msk [vmem:[%s1497_s21 + $0x30] sm:$0xff] %vm766_vm0, %v740_v58  ;;  %789 = vst.msk [vmem:[%s1497_s21 + $0xb0] sm:$0xff] %vm766_vm0, %v756_v59  ;;  %v635_v0 = vadd.f32 %v1018_v60, %v1490_v50  ;;  %v699_v1 = vadd.f32 %v1066_v61, %v1490_v50 }
 0x12a   : > { %v1020_v2 = vpop.f32.mrf.mxu0  ;;  %v1068_v3 = vpop.f32.mrf.mxu1 }
 0x12b   : > { %v741_v4 = vmax.f32 %v635_v0, 0.0  ;;  %v757_v5 = vmax.f32 %v699_v1, 0.0  ;;  %v1021_v6 = vadd.f32 %v1020_v2, %v1019_v62  ;;  %v1069_v7 = vadd.f32 %v1068_v3, %v1067_v63 }
 0x12c   : > { %v1022_v8 = vpop.f32.mrf.mxu0  ;;  %v1070_v9 = vpop.f32.mrf.mxu1 }
 0x12d   : > { %774 = vst.msk [vmem:[%s1497_s21 + $0x38] sm:$0xff] %vm766_vm0, %v741_v4  ;;  %790 = vst.msk [vmem:[%s1497_s21 + $0xb8] sm:$0xff] %vm766_vm0, %v757_v5  ;;  %v640_v10 = vadd.f32 %v1021_v6, %v1490_v50  ;;  %v704_v11 = vadd.f32 %v1069_v7, %v1490_v50 }
 0x12e   : > { %v1023_v12 = vpop.f32.mrf.mxu0  ;;  %v1071_v13 = vpop.f32.mrf.mxu1 }
 0x12f   : > { %v742_v14 = vmax.f32 %v640_v10, 0.0  ;;  %v758_v15 = vmax.f32 %v704_v11, 0.0  ;;  %v1024_v16 = vadd.f32 %v1023_v12, %v1022_v8  ;;  %v1072_v17 = vadd.f32 %v1071_v13, %v1070_v9 }
 0x130   : > { %v1025_v18 = vpop.f32.mrf.mxu0  ;;  %v1073_v19 = vpop.f32.mrf.mxu1 }
 0x131   : > { %775 = vst.msk [vmem:[%s1497_s21 + $0x40] sm:$0xff] %vm766_vm0, %v742_v14  ;;  %791 = vst.msk [vmem:[%s1497_s21 + $0xc0] sm:$0xff] %vm766_vm0, %v758_v15  ;;  %v643_v20 = vadd.f32 %v1024_v16, %v1490_v50  ;;  %v707_v21 = vadd.f32 %v1072_v17, %v1490_v50 }
 0x132   : > { %v1026_v22 = vpop.f32.mrf.mxu0  ;;  %v1074_v23 = vpop.f32.mrf.mxu1 }
 0x133   : > { %v743_v24 = vmax.f32 %v643_v20, 0.0  ;;  %v759_v25 = vmax.f32 %v707_v21, 0.0  ;;  %v1027_v26 = vadd.f32 %v1026_v22, %v1025_v18  ;;  %v1075_v27 = vadd.f32 %v1074_v23, %v1073_v19 }
 0x134   : > { %v1028_v28 = vpop.f32.mrf.mxu0  ;;  %v1076_v29 = vpop.f32.mrf.mxu1 }
 0x135   : > { %776 = vst.msk [vmem:[%s1497_s21 + $0x48] sm:$0xff] %vm766_vm0, %v743_v24  ;;  %792 = vst.msk [vmem:[%s1497_s21 + $0xc8] sm:$0xff] %vm766_vm0, %v759_v25  ;;  %v648_v30 = vadd.f32 %v1027_v26, %v1490_v50  ;;  %v712_v31 = vadd.f32 %v1075_v27, %v1490_v50 }
 0x136   : > { %v1029_v32 = vpop.f32.mrf.mxu0  ;;  %v1077_v33 = vpop.f32.mrf.mxu1 }
 0x137   : > { %v744_v34 = vmax.f32 %v648_v30, 0.0  ;;  %v760_v35 = vmax.f32 %v712_v31, 0.0  ;;  %v1030_v36 = vadd.f32 %v1029_v32, %v1028_v28  ;;  %v1078_v37 = vadd.f32 %v1077_v33, %v1076_v29 }
 0x138   : > { %v1031_v38 = vpop.f32.mrf.mxu0  ;;  %v1079_v39 = vpop.f32.mrf.mxu1 }
 0x139   : > { %777 = vst.msk [vmem:[%s1497_s21 + $0x50] sm:$0xff] %vm766_vm0, %v744_v34  ;;  %793 = vst.msk [vmem:[%s1497_s21 + $0xd0] sm:$0xff] %vm766_vm0, %v760_v35  ;;  %v651_v40 = vadd.f32 %v1030_v36, %v1490_v50  ;;  %v715_v41 = vadd.f32 %v1078_v37, %v1490_v50 }
 0x13a   : > { %v1032_v42 = vpop.f32.mrf.mxu0  ;;  %v1080_v43 = vpop.f32.mrf.mxu1 }
 0x13b   : > { %v745_v44 = vmax.f32 %v651_v40, 0.0  ;;  %v761_v45 = vmax.f32 %v715_v41, 0.0  ;;  %v1033_v46 = vadd.f32 %v1032_v42, %v1031_v38  ;;  %v1081_v47 = vadd.f32 %v1080_v43, %v1079_v39 }
 0x13c   : > { %v1034_v48 = vpop.f32.mrf.mxu0  ;;  %v1082_v49 = vpop.f32.mrf.mxu1 }
 0x13d   : > { %778 = vst.msk [vmem:[%s1497_s21 + $0x58] sm:$0xff] %vm766_vm0, %v745_v44  ;;  %794 = vst.msk [vmem:[%s1497_s21 + $0xd8] sm:$0xff] %vm766_vm0, %v761_v45  ;;  %v656_v51 = vadd.f32 %v1033_v46, %v1490_v50  ;;  %v720_v52 = vadd.f32 %v1081_v47, %v1490_v50 }
 0x13e   : > { %v1035_v53 = vpop.f32.mrf.mxu0  ;;  %v1083_v54 = vpop.f32.mrf.mxu1 }
 0x13f   : > { %v746_v55 = vmax.f32 %v656_v51, 0.0  ;;  %v762_v56 = vmax.f32 %v720_v52, 0.0  ;;  %v1036_v57 = vadd.f32 %v1035_v53, %v1034_v48  ;;  %v1084_v58 = vadd.f32 %v1083_v54, %v1082_v49 }
 0x140   : > { %v1037_v59 = vpop.f32.mrf.mxu0  ;;  %v1085_v60 = vpop.f32.mrf.mxu1 }
 0x141   : > { %779 = vst.msk [vmem:[%s1497_s21 + $0x60] sm:$0xff] %vm766_vm0, %v746_v55  ;;  %795 = vst.msk [vmem:[%s1497_s21 + $0xe0] sm:$0xff] %vm766_vm0, %v762_v56  ;;  %v659_v61 = vadd.f32 %v1036_v57, %v1490_v50  ;;  %v723_v62 = vadd.f32 %v1084_v58, %v1490_v50 }
 0x142   : > { %v1038_v63 = vpop.f32.mrf.mxu0  ;;  %v1086_v0 = vpop.f32.mrf.mxu1 }
 0x143   : > { %v747_v1 = vmax.f32 %v659_v61, 0.0  ;;  %v763_v2 = vmax.f32 %v723_v62, 0.0  ;;  %v1039_v3 = vadd.f32 %v1038_v63, %v1037_v59  ;;  %v1087_v4 = vadd.f32 %v1086_v0, %v1085_v60 }
 0x144   : > { %v1040_v5 = vpop.f32.mrf.mxu0  ;;  %v1088_v6 = vpop.f32.mrf.mxu1 }
 0x145   : > { %780 = vst.msk [vmem:[%s1497_s21 + $0x68] sm:$0xff] %vm766_vm0, %v747_v1  ;;  %796 = vst.msk [vmem:[%s1497_s21 + $0xe8] sm:$0xff] %vm766_vm0, %v763_v2  ;;  %v664_v7 = vadd.f32 %v1039_v3, %v1490_v50  ;;  %v728_v8 = vadd.f32 %v1087_v4, %v1490_v50 }
 0x146   : > { %v1041_v9 = vpop.f32.mrf.mxu0  ;;  %v1089_v10 = vpop.f32.mrf.mxu1 }
 0x147   : > { %v748_v11 = vmax.f32 %v664_v7, 0.0  ;;  %v764_v12 = vmax.f32 %v728_v8, 0.0  ;;  %v1042_v13 = vadd.f32 %v1041_v9, %v1040_v5  ;;  %v1090_v14 = vadd.f32 %v1089_v10, %v1088_v6 }
 0x149   : > { %781 = vst.msk [vmem:[%s1497_s21 + $0x70] sm:$0xff] %vm766_vm0, %v748_v11  ;;  %797 = vst.msk [vmem:[%s1497_s21 + $0xf0] sm:$0xff] %vm766_vm0, %v764_v12  ;;  %v667_v15 = vadd.f32 %v1042_v13, %v1490_v50  ;;  %v731_v16 = vadd.f32 %v1090_v14, %v1490_v50 }
 0x14b   : > { %v749_v17 = vmax.f32 %v667_v15, 0.0  ;;  %v765_v18 = vmax.f32 %v731_v16, 0.0 }
 0x14d   : > { %782 = vst.msk [vmem:[%s1497_s21 + $0x78] sm:$0xff] %vm766_vm0, %v749_v17  ;;  %798 = vst.msk [vmem:[%s1497_s21 + $0xf8] sm:$0xff] %vm766_vm0, %v765_v18 }
 0x14e PF: > { %s16_s17 = sadd.s32 1, %s1306_s17   ;;  %s1618_s12 = smov %s1290_s13 }
 0x14f   : > { %p13_p8 = scmp.ge.s32.totalorder %s16_s17, 4   ;;  %s1619_s13 = smov %s1294_s14 }
 0x150   : > { %s1620_s14 = smov %s1380_s24  ;;  %s1621_s15 = smov %s1302_s16 }
 0x151   : > { %s1622_s16 = smov %s1624_s19  ;;  %15 = sbr.rel (!%p13_p8) target bundleno = 4 (0x4), region = 78 }
 0x156   :  { %827 = vsyncpa [#allocation3], 1 }
 0x157   :  { %829 = vsyncpa [#allocation3 + $0x1], 1 }

</bundles_post_ra>
